<compile_context>
chip_gen: v7x
topology: tpu7x:2x2x1
jax: 0.10.0
libtpu: 0.0.40
codegen_flags: <defaults>
</compile_context>

<pallas_src>
import jax
import jax.numpy as jnp
from jax.experimental import pallas as pl
from jax.experimental.pallas import tpu as pltpu


def _round_up(x, m):
    return (x + m - 1) // m * m


def _conv_relu_kernel(p_ref, w_ref, b_ref, o_ref):
    # p_ref: (1, KKC_p, TS)   im2col patch tile: contraction dim on sublanes,
    #                         flattened spatial positions on lanes
    # w_ref: (Cout_p, KKC_p)  dense 2-D weights (constant index_map -> VMEM resident)
    # b_ref: (Cout_p, 1)      bias (f32)
    # o_ref: (1, Cout_p, TS)  lane-dense output tile
    acc = jnp.dot(w_ref[...], p_ref[0], preferred_element_type=jnp.float32)
    acc = acc + b_ref[...]                      # bias folded in (lane broadcast)
    o_ref[0] = jnp.maximum(acc, 0.0).astype(o_ref.dtype)


def conv2d_relu(x_nchw, weight_oihw, bias, *, padding=1, spatial_tile=128,
                mxu_dtype=None):
    """Conv2d(kernel=K, padding=padding, stride=1) + ReLU, PyTorch NCHW semantics.

    mxu_dtype: optional dtype (e.g. jnp.bfloat16) for the matmul operands on
               v6e/v7x; accumulation stays f32 and output keeps x_nchw.dtype.
    """
    N, Cin, H, W = x_nchw.shape
    Cout, Cin_w, KH, KW = weight_oihw.shape
    assert Cin == Cin_w and KH == KW, "square kernel / matching Cin required"
    K = KH

    Hp, Wp = H + 2 * padding, W + 2 * padding
    Ho, Wo = Hp - K + 1, Wp - K + 1            # stride 1
    S = Ho * Wo
    KKC = K * K * Cin

    # TPU-friendly padded sizes.
    TS = spatial_tile
    assert TS % 128 == 0, "spatial tile must be a multiple of 128 (lane width)"
    S_p = _round_up(S, TS)
    Cout_p = _round_up(Cout, 8)                # sublane granularity
    KKC_p = _round_up(KKC, 8)

    # ---- JAX glue: zero-pad + im2col (stays NCHW, no transposes) ----
    x_pad = jnp.pad(
        x_nchw, ((0, 0), (0, 0), (padding, padding), (padding, padding)))
    cols = []
    for kh in range(K):
        for kw in range(K):
            cols.append(x_pad[:, :, kh:kh + Ho, kw:kw + Wo])    # (N, Cin, Ho, Wo)
    patches = jnp.stack(cols, axis=1).reshape(N, KKC, S)
    patches = jnp.pad(patches, ((0, 0), (0, KKC_p - KKC), (0, S_p - S)))

    # Dense 2-D weights: w2[co, (kh*K+kw)*Cin + ci] = weight[co, ci, kh, kw]
    w2 = jnp.transpose(weight_oihw, (0, 2, 3, 1)).reshape(Cout, KKC)
    w2 = jnp.pad(w2, ((0, Cout_p - Cout), (0, KKC_p - KKC)))
    b2 = jnp.pad(bias, (0, Cout_p - Cout)).reshape(Cout_p, 1).astype(jnp.float32)

    if mxu_dtype is not None:
        patches = patches.astype(mxu_dtype)
        w2 = w2.astype(mxu_dtype)

    grid = (N, S_p // TS)

    out_flat = pl.pallas_call(
        _conv_relu_kernel,
        out_shape=jax.ShapeDtypeStruct((N, Cout_p, S_p), x_nchw.dtype),
        grid_spec=pltpu.PrefetchScalarGridSpec(
            num_scalar_prefetch=0,
            grid=grid,
            in_specs=[
                pl.BlockSpec((1, KKC_p, TS), lambda n, s: (n, 0, s)),
                pl.BlockSpec((Cout_p, KKC_p), lambda n, s: (0, 0)),
                pl.BlockSpec((Cout_p, 1), lambda n, s: (0, 0)),
            ],
            out_specs=pl.BlockSpec((1, Cout_p, TS), lambda n, s: (n, 0, s)),
        ),
        compiler_params=pltpu.CompilerParams(
            dimension_semantics=("parallel", "parallel"),
            vmem_limit_bytes=64 * 1024 * 1024,
        ),
    )(patches, w2, b2)

    # Drop channel/spatial padding (no-op when already aligned) and reshape to NCHW.
    out = out_flat[:, :Cout, :S].reshape(N, Cout, Ho, Wo)
    return out


if __name__ == "__main__":
    # Module config (bn=False default): Conv2d(4, 8, kernel=3, padding=1) + ReLU.
    # TODO(synk): bn=True (BatchNorm2d) path not implemented; module default is bn=False.
    N, Cin, H, W = 2, 4, 16, 16
    Cout, K, pad = 8, 3, 1

    key = jax.random.PRNGKey(0)
    kx, kw, kb = jax.random.split(key, 3)

    x = jax.random.normal(kx, (N, Cin, H, W), dtype=jnp.float32)
    # Deterministic parameter init (PyTorch-like uniform bound 1/sqrt(fan_in)).
    bound = 1.0 / (Cin * K * K) ** 0.5
    weight = jax.random.uniform(
        kw, (Cout, Cin, K, K), minval=-bound, maxval=bound, dtype=jnp.float32)
    bias = jax.random.uniform(
        kb, (Cout,), minval=-bound, maxval=bound, dtype=jnp.float32)

    # Reference: XLA conv + bias + ReLU (same semantics as torch Conv2d + ReLU).
    ref = jax.lax.conv_general_dilated(
        x, weight, window_strides=(1, 1), padding=((pad, pad), (pad, pad)),
        dimension_numbers=("NCHW", "OIHW", "NCHW"),
    ) + bias[None, :, None, None]
    ref = jnp.maximum(ref, 0.0)

    # f32 path.
    out = jax.block_until_ready(conv2d_relu(x, weight, bias, padding=pad))
    assert out.shape == (N, Cout, H, W)
    assert jnp.allclose(out, ref, rtol=1e-4, atol=1e-4)

    # bf16 MXU-operand path (v6e/v7x fast path), f32 accumulation.
    out_bf16 = jax.block_until_ready(
        conv2d_relu(x, weight, bias, padding=pad, mxu_dtype=jnp.bfloat16))
    assert out_bf16.shape == (N, Cout, H, W)
    assert jnp.allclose(out_bf16, ref, rtol=3e-2, atol=3e-2)

    print("KERNEL_OK")
</pallas_src>

<mosaic_0001>
module attributes {stable_mosaic.version = 11 : i64} {
  func.func @_conv_relu_kernel(%arg0: i32, %arg1: i32, %arg2: memref<1x40x128xf32, #tpu.memory_space<vmem>>, %arg3: memref<8x40xf32, #tpu.memory_space<vmem>>, %arg4: memref<8x1xf32, #tpu.memory_space<vmem>>, %arg5: memref<1x8x128xf32, #tpu.memory_space<vmem>>) attributes {dimension_semantics = [#tpu.dimension_semantics<parallel>, #tpu.dimension_semantics<parallel>], iteration_bounds = array<i64: 2, 2>, scalar_prefetch = 0 : i64, scratch_operands = 0 : i64, tpu.core_type = #tpu.core_type<tc>, window_params = [{transform_indices = @transform_0, window_bounds = array<i64: 1, 40, 128>}, {pipeline_mode = #tpu.pipeline_mode<synchronous>, transform_indices = @transform_1, window_bounds = array<i64: 8, 40>}, {pipeline_mode = #tpu.pipeline_mode<synchronous>, transform_indices = @transform_2, window_bounds = array<i64: 8, 1>}, {transform_indices = @transform_3, window_bounds = array<i64: 1, 8, 128>}]} {
    %c0 = arith.constant 0 : index
    %c0_0 = arith.constant 0 : index
    %0 = vector.load %arg3[%c0, %c0_0] : memref<8x40xf32, #tpu.memory_space<vmem>>, vector<8x40xf32>
    %c0_1 = arith.constant 0 : index
    %c0_2 = arith.constant 0 : index
    %c0_3 = arith.constant 0 : index
    %1 = vector.load %arg2[%c0_1, %c0_2, %c0_3] : memref<1x40x128xf32, #tpu.memory_space<vmem>>, vector<1x40x128xf32>
    %2 = vector.shape_cast %1 : vector<1x40x128xf32> to vector<40x128xf32>
    %cst = arith.constant dense<0.000000e+00> : vector<8x128xf32>
    %3 = tpu.matmul %0, %2, %cst {dimension_numbers = #tpu.dot_dimension_numbers<[1], [0], [0], [1], [0, 0, 1, 1], [], []>} : vector<8x40xf32>, vector<40x128xf32>, vector<8x128xf32> -> vector<8x128xf32>
    %c0_4 = arith.constant 0 : index
    %c0_5 = arith.constant 0 : index
    %4 = vector.load %arg4[%c0_4, %c0_5] : memref<8x1xf32, #tpu.memory_space<vmem>>, vector<8x1xf32>
    %5 = vector.broadcast %4 : vector<8x1xf32> to vector<8x128xf32>
    %6 = arith.addf %3, %5 : vector<8x128xf32>
    %cst_6 = arith.constant 0.000000e+00 : f32
    %7 = vector.broadcast %cst_6 : f32 to vector<8x128xf32>
    %8 = arith.maximumf %6, %7 : vector<8x128xf32>
    %c0_7 = arith.constant 0 : index
    %c0_8 = arith.constant 0 : index
    %c0_9 = arith.constant 0 : index
    %9 = vector.load %arg5[%c0_7, %c0_8, %c0_9] : memref<1x8x128xf32, #tpu.memory_space<vmem>>, vector<1x8x128xf32>
    %10 = vector.shape_cast %9 : vector<1x8x128xf32> to vector<8x128xf32>
    %11 = vector.shape_cast %8 : vector<8x128xf32> to vector<1x8x128xf32>
    tpu.vector_store %arg5[%c0_7, %c0_8, %c0_9], %11 {strides = array<i32>} : memref<1x8x128xf32, #tpu.memory_space<vmem>>, vector<1x8x128xf32>,
    return
  }
  func.func @transform_0(%arg0: i32, %arg1: i32) -> (i32, i32, i32) {
    %c0_i32 = arith.constant 0 : i32
    %c0_i32_0 = arith.constant 0 : i32
    return %arg0, %c0_i32, %arg1 : i32, i32, i32
  }
  func.func @transform_1(%arg0: i32, %arg1: i32) -> (i32, i32) {
    %c0_i32 = arith.constant 0 : i32
    %c0_i32_0 = arith.constant 0 : i32
    %c0_i32_1 = arith.constant 0 : i32
    return %c0_i32, %c0_i32_0 : i32, i32
  }
  func.func @transform_2(%arg0: i32, %arg1: i32) -> (i32, i32) {
    %c0_i32 = arith.constant 0 : i32
    %c0_i32_0 = arith.constant 0 : i32
    %c0_i32_1 = arith.constant 0 : i32
    return %c0_i32, %c0_i32_0 : i32, i32
  }
  func.func @transform_3(%arg0: i32, %arg1: i32) -> (i32, i32, i32) {
    %c0_i32 = arith.constant 0 : i32
    %c0_i32_0 = arith.constant 0 : i32
    return %arg0, %c0_i32, %arg1 : i32, i32, i32
  }
}

</mosaic_0001>

<bundles_post_ra>
// kernel: tpu_custom_call.1
= control target key start
LH: loop header
LB: loop body
LE: loop exit
PB: predicated region body
PF: predicated region fallthrough
CT: control target
= control target key end

     0   :  { %s1081_s0 = inlined_call_operand.hbm [shape: f32[2,40,256], index: 0, kind: input, shape index: {}]   ;;  %s1082_s1 = inlined_call_operand.hbm [shape: f32[8,40], index: 1, kind: input, shape index: {}]   ;;  %s1083_s2 = inlined_call_operand.hbm [shape: f32[8,1], index: 2, kind: input, shape index: {}]   ;;  %s1084_s3 = inlined_call_operand.hbm [shape: f32[2,8,256], index: 3, kind: output, shape index: {}]  }
   0x1   :  { %1092 = sst [smem:[#allocation13_spill]] %s1082_s1 }
   0x2   :  { %1093 = sst [smem:[#allocation14_spill]] %s1083_s2 }
   0x3   :  { %8 = vsyncpa [#allocation3], 0 }
   0x4   :  { %10 = vsyncpa [#allocation3 + $0x1], 0 }
   0x5   :  { %11 = vsyncpa [#allocation6], 0 }
   0x6   :  { %12 = vsyncpa [#allocation4], 0 }
   0x7   :  { %14 = vsyncpa [#allocation4 + $0x1], 0  ;;  %s812_s12 = smov 0   ;;  %s814_s13 = smov 0  }
   0x8   :  { %s816_s14 = smov 0   ;;  %s818_s15 = smov 0  }
   0x9   :  { %s820_s16 = smov 0   ;;  %s822_s17 = smov 0  }
   0xa   :  { %s824_s18 = smov 0   ;;  %s826_s19 = smov 0  }
   0xb LB: > { %s439_s20 = sadd.s32 4294967295, %s779_s19   ;;  %s440_s21 = sadd.s32 4294967294, %s779_s19   ;;  %s779_s19 = sphi %s826_s19, %s20_s19   ;;  %s775_s18 = sphi %s824_s18, %s1119_s18   ;;  %s771_s17 = sphi %s822_s17, %s1118_s17   ;;  %s767_s16 = sphi %s820_s16, %s1117_s16   ;;  %s763_s15 = sphi %s818_s15, %s1116_s15   ;;  %s759_s14 = sphi %s816_s14, %s1115_s14   ;;  %s755_s13 = sphi %s814_s13, %s1114_s13   ;;  %s751_s12 = sphi %s812_s12, %s1113_s12  }
   0xc   : > { %p48_p0 = scmp.ne.s32.totalorder %s759_s14, %s755_s13  ;;  %p49_p1 = scmp.eq.s32.totalorder %s779_s19, 0 }
   0xd   : > { %p54_p2 = scmp.ne.s32.totalorder %s755_s13, %s751_s12  ;;  %p860_p3 = scmp.eq.s32.totalorder %s439_s20, 0 }
   0xe   : > { %p122_p4 = scmp.eq.s32.totalorder %s439_s20, 3  ;;  %p864_p5 = por %p49_p1, %p48_p0 }
   0xf   : > { %s1094_s23 = scalar_select %p860_p3, 1, 0 }
  0x10   : > { %p128_p6 = scmp.eq.s32.totalorder %s440_s21, 3  ;;  %p870_p7 = por %p860_p3, %p54_p2 }
  0x11   : > { %p874_p8 = por %p122_p4, %p48_p0  ;;  %p441_p10 = scmp.ge.s32.totalorder %s779_s19, 1 }
  0x12   : > { %s1096_s25 = scalar_select %p870_p7, 1, 0 }
  0x13   : > { %s1097_s26 = scalar_select %p874_p8, 1, 0 }
  0x14   : > { %p878_p9 = por %p128_p6, %p54_p2  ;;  %p135_p11 = scmp.lt.s32.totalorder %s779_s19, 5 }
  0x15   : > { %s781_s29 = smov [#allocation5]   ;;  %p513_p13 = scmp.lt.s32.totalorder %s779_s19, 4 }
  0x16   : > { %s1098_s27 = scalar_select %p878_p9, 1, 0 }
  0x17   : > { %p884_p12 = pnand %p441_p10, %p135_p11  ;;  %s148_s30 = sshll.u32 %s781_s29, 4  ;;  %s149_s30 = int_to_ptr.vmem [resolvable:$true] %s148_s30 }
  0x18   : > { %p893_p1 = pnand %p513_p13, %p864_p5  ;;  %s782_s5 = smov [#allocation7]  }
  0x19   : > { %s1099_s28 = scalar_select %p884_p12, 1, 0 }
  0x1a   : > { %p496_p0 = pneg %p884_p12  ;;  %s159_s6 = sshll.u32 %s782_s5, 4  ;;  %s903_s6 = int_to_ptr.vmem [resolvable:$true] %s159_s6 }
  0x1b   : > { %s1100_s4 = scalar_select %p893_p1, 1, 0 }
  0x1c   : > { %p899_p2 = pnand %p496_p0, %p860_p3  ;;  %s1102_s1 = sld [smem:[#allocation13_spill]] }
  0x1e   : > { %p593_p5 = pneg %p899_p2 }
  0x22   : > { %s591_s10 = scalar_lea.hbm %s1102_s1, 128 }
  0x23   : > { %p592_p4 = scmp.ne.s32.totalorder %s1102_s1, %s591_s10  ;;  %p598_p11 = scmp.lt.u32.totalorder %s591_s10, %s1102_s1 }
  0x25   : > { %p594_p6 = pnand %p593_p5, %p592_p4 }
  0x27   : > { %p595_p10 = pneg %p594_p6 }
  0x29   : > { %p600_p13 = pnand %p598_p11, %p595_p10 }
  0x2b   : > { %603 = shalt.err (!%p600_p13)
}
  0x2c   : > { %s604_s29 = scalar_lea.vmem %s149_s30, 128  ;;  %p612_p3 = scmp.lt.s32.totalorder %s149_s30, %s149_s30 }
  0x2d   : > { %p605_p0 = scmp.ne.s32.totalorder %s149_s30, %s604_s29  ;;  %p613_p7 = scmp.lt.s32.totalorder %s604_s29, %s604_s29 }
  0x2f   : > { %p607_p9 = pnand %p605_p0, %p593_p5  ;;  %p614_p12 = por %p613_p7, %p612_p3 }
  0x31   : > { %p608_p8 = pneg %p607_p9 }
  0x33   : > { %p615_p1 = pnand %p614_p12, %p608_p8 }
  0x35   : > { %618 = shalt.err (!%p615_p1)
}
  0x36   : > { %499 = dma.hbm_to_vmem [thread:$0]  (!%p899_p2), %s1102_s1, 128, %s149_s30, [#allocation6]  }
  0x37   : > { %s1103_s2 = sld [smem:[#allocation14_spill]] }
  0x3d   : > { %s619_s11 = scalar_lea.hbm %s1103_s2, 128 }
  0x3e   : > { %p620_p9 = scmp.ne.s32.totalorder %s1103_s2, %s619_s11  ;;  %p626_p8 = scmp.lt.u32.totalorder %s619_s11, %s1103_s2 }
  0x40   : > { %p622_p3 = pnand %p620_p9, %p593_p5 }
  0x42   : > { %p623_p7 = pneg %p622_p3 }
  0x44   : > { %p628_p12 = pnand %p626_p8, %p623_p7 }
  0x46   : > { %631 = shalt.err (!%p628_p12)
}
  0x47   : > { %s632_s30 = scalar_lea.vmem %s903_s6, 128  ;;  %p640_p10 = scmp.lt.s32.totalorder %s903_s6, %s903_s6 }
  0x48   : > { %p633_p1 = scmp.ne.s32.totalorder %s903_s6, %s632_s30  ;;  %p641_p11 = scmp.lt.s32.totalorder %s632_s30, %s632_s30 }
  0x4a   : > { %p635_p4 = pnand %p633_p1, %p593_p5  ;;  %p642_p13 = por %p641_p11, %p640_p10 }
  0x4c   : > { %p636_p6 = pneg %p635_p4 }
  0x4e   : > { %p643_p0 = pnand %p642_p13, %p636_p6 }
  0x50   : > { %646 = shalt.err (!%p643_p0)
}
  0x51   : > { %502 = dma.hbm_to_vmem [thread:$0]  (!%p899_p2), %s1103_s2, 128, %s903_s6, [#allocation6]  }
  0x52   : > { %s29_s9 = sadd.s32 1, %s771_s17  ;;  %s32_s10 = sadd.s32 1, %s775_s18 }
  0x53   : > { %p30_p5 = scmp.ge.s32.totalorder %s29_s9, 2  ;;  %s170_s11 = sand.u32 1, %s759_s14  }
  0x54   : > { %s481_s20 = smul.u32 40, %s170_s11  ;;  %p1106_p7 = scmp.ne.s32.totalorder %s1100_s4, 0 }
  0x55   : > { %s1121_s9 = smov (%p30_p5, %s29_s9), 0  ;;  %s1123_s10 = smov (!%p30_p5, %s32_s10), %s775_s18 }
  0x56   : > { %1104 = sst [smem:[#allocation12_spill]] %s1121_s9  ;;  %s37_s7 = ssub.s32 %s771_s17, %s1121_s9 }
  0x57   : > { %p34_p9 = scmp.ge.s32.totalorder %s1123_s10, 2  ;;  %s482_s21 = smul.u32 10, %s775_s18 }
  0x58   : > { %s174_s24 = scalar_lea.vmem [#allocation2], %s481_s20  ;;  %s1105_s20 = sadd.s32 1, %s759_s14 }
  0x59   : > { %s182_s29 = sshll.u32 %s174_s24, 4  ;;  %s1125_s10 = smov (%p34_p9, %s1123_s10), 0  ;;  %s964_s29 = int_to_ptr.vmem [resolvable:$true] %s182_s29 }
  0x5a   : > { %s179_s6 = sadd.s32 %s771_s17, %s482_s21  ;;  %s36_s30 = ssub.s32 %s775_s18, %s1125_s10 }
  0x5b   : > { %s445_s5 = sshll.u32 %s179_s6, 7  ;;  %s38_s8 = sor.u32 %s37_s7, %s36_s30 }
  0x5c   : > { %s971_s2 = scalar_lea.hbm %s1081_s0, %s445_s5  ;;  %p39_p2 = scmp.eq.s32.totalorder %s38_s8, 0 }
  0x5d   : > { %s978_s9 = scalar_lea.sflag [#allocation3], %s170_s11  ;;  %s647_s21 = scalar_lea.hbm %s971_s2, 640 }
  0x5e   : > { %s976_s24 = scalar_select %p39_p2, %s759_s14, %s1105_s20  }
  0x5f   : > { %p648_p3 = scmp.ne.s32.totalorder %s971_s2, %s647_s21  ;;  %p649_p8 = pneg %p1106_p7 }
  0x60   : > { %s652_s7 = scalar_lea.hbm %s1081_s0, 2560  ;;  %p653_p4 = scmp.lt.u32.totalorder %s971_s2, %s1081_s0 }
  0x61   : > { %p650_p12 = pnand %p649_p8, %p648_p3  ;;  %p654_p6 = scmp.lt.u32.totalorder %s652_s7, %s647_s21 }
  0x62   : > { %p656_p11 = scmp.lt.u32.totalorder %s647_s21, %s971_s2 }
  0x63   : > { %p651_p1 = pneg %p650_p12  ;;  %p655_p10 = por %p654_p6, %p653_p4 }
  0x65   : > { %p657_p13 = por %p656_p11, %p655_p10 }
  0x67   : > { %p658_p0 = pnand %p657_p13, %p651_p1 }
  0x69   : > { %661 = shalt.err (!%p658_p0)
}
  0x6a   : > { %s662_s11 = scalar_lea.vmem %s964_s29, 640  ;;  %s783_s5 = smov [#allocation2]  }
  0x6b   : > { %p663_p5 = scmp.ne.s32.totalorder %s964_s29, %s662_s11  ;;  %s667_s8 = sshll.u32 %s783_s5, 4  ;;  %s668_s8 = int_to_ptr.vmem [resolvable:$false] %s667_s8 }
  0x6c   : > { %s669_s20 = scalar_lea.vmem %s668_s8, 1280  ;;  %p670_p3 = scmp.lt.s32.totalorder %s964_s29, %s668_s8 }
  0x6d   : > { %p665_p9 = pnand %p663_p5, %p649_p8  ;;  %p671_p12 = scmp.lt.s32.totalorder %s669_s20, %s662_s11 }
  0x6f   : > { %p666_p2 = pneg %p665_p9  ;;  %p672_p4 = por %p671_p12, %p670_p3 }
  0x71   : > { %p673_p6 = pnand %p672_p4, %p666_p2 }
  0x73   : > { %676 = shalt.err (!%p673_p6)
}
  0x74   : > { %s784_s21 = smov 256   ;;  %s785_s1 = smov 128  }
  0x75   : > { %s786_s22 = smov 8   ;;  %p1107_p8 = scmp.ne.s32.totalorder %s1099_s28, 0 }
  0x76   : > { %506 = dma.hbm_to_vmem [thread:$0]  (!%p1106_p7), %s971_s2, 640, %s964_s29, %s978_s9, %s784_s21, %s785_s1, %s786_s22  }
  0x77   : > { %194 = sbr.rel (%p1107_p8) target bundleno = 373 (0x175), region = 32  ;;  %s1009_s7 = sand.u32 (!%p1107_p8), 1, %s755_s13  }
  0x78   : > { %s483_s6 = smul.u32 (!%p1107_p8), 40, %s1009_s7  ;;  %s197_s30 = scalar_lea.sflag (!%p1107_p8), [#allocation3], %s1009_s7 }
  0x79   : > { %p1108_p1 = scmp.ne.s32.totalorder (!%p1107_p8), %s1096_s25, 0 }
  0x7a   : > { %s200_s11 = scalar_lea.vmem (!%p1107_p8), [#allocation2], %s483_s6 }
  0x7e   : > { %738 = dma.done.wait (%p1108_p1), %s197_s30, 640  }
  0x7f   : > { %740 = vsyncadd (%p1108_p1), %s197_s30, 4294966656  ;;  %p1109_p10 = scmp.ne.s32.totalorder %s1094_s23, 0 }
  0x81   : > { %742 = dma.done.wait (%p1109_p10), [#allocation6], 256  }
  0x82   : > { %744 = vsyncadd (%p1109_p10), [#allocation6], 4294967040  ;;  %v787_v0 = vmov 0.0|0.0   ;;  %vm788_vm0 = vmmov 0   ;;  %v789_v1 = vmov 0.0   ;;  %v790_v2 = vmov 0  }
  0x83   : > { %475 = vmatprep.subr.bf16.mxu0 %v787_v0  ;;  %472 = vmatprep.mubr.msk.f32.mxu0 %vm788_vm0, %v789_v1  ;;  %v232_v3 = vld [vmem:[%s200_s11] sm:$0xff]  ;;  %v233_v4 = vld [vmem:[%s200_s11 + $0x8] sm:$0xff]  ;;  %v234_v5 = vld [vmem:[%s200_s11 + $0x10] sm:$0xff]  ;;  %vm243_vm1 = vcmask 326656   ;;  %s449_s2 = sshll.u32 %s1009_s7, 3  ;;  %s452_s23 = sshll.u32 %s767_s16, 1 }
  0x84   : > { %590 = vset.pattern.permute.xlu0 %v790_v2  ;;  %v476_v6 = vpack.c.bf16 %v233_v4, %v232_v3  ;;  %v235_v7 = vld [vmem:[%s200_s11 + $0x18] sm:$0xff]  ;;  %v236_v10 = vld [vmem:[%s200_s11 + $0x20] sm:$0xff]  ;;  %v231_v11 = vld [vmem:[#allocation5] sm:$0xff]  ;;  %s331_s25 = sadd.s32 %s763_s15, %s452_s23  ;;  %s230_s4 = scalar_lea.vmem [#allocation8], %s449_s2 }
  0x85   : > { %v237_v8 = vld [vmem:[#allocation7] sm:$0xff]  ;;  %v479_v9 = vpack.c.bf16 %v235_v7, %v234_v5  ;;  %s453_s28 = sshll.u32 %s331_s25, 7  ;;  %s335_s9 = sshll.u32 %s230_s4, 4  ;;  %s1029_s9 = int_to_ptr.vmem [resolvable:$true] %s335_s9 }
  0x86   : > { %477 = vmatpush3.bf16.msra.mxu0 %v476_v6  ;;  %240 = vperm.xlu0 %590, %v237_v8   ;;  %s1027_s8 = scalar_lea.hbm %s1084_s3, %s453_s28  ;;  %s320_s15 = scalar_lea.sflag [#allocation4], %s1009_s7 }
  0x87   : > { %478 = vmatprep.subr.bf16.mxu0 %v787_v0  ;;  %s677_s16 = scalar_lea.vmem %s1029_s9, 128  ;;  %p1110_p11 = scmp.ne.s32.totalorder %s1097_s26, 0 }
  0x88   : > { %p678_p7 = scmp.ne.s32.totalorder %s1029_s9, %s677_s16  ;;  %s791_s20 = smov [#allocation8]  }
  0x89   : > { %s681_s21 = sshll.u32 %s791_s20, 4  ;;  %s682_s21 = int_to_ptr.vmem [resolvable:$false] %s681_s21 }
  0x8a   : > { %480 = vmatpush3.bf16.msra.mxu0 %v479_v9  ;;  %p679_p13 = pnand %p678_p7, %p1110_p11  ;;  %s683_s1 = scalar_lea.vmem %s682_s21, 256 }
  0x8b   : > { %470 = vmatprep.subr.mxu0 %v789_v1  ;;  %p684_p5 = scmp.lt.s32.totalorder %s1029_s9, %s682_s21  ;;  %p685_p9 = scmp.lt.s32.totalorder %s683_s1, %s677_s16 }
  0x8c   : > { %p680_p0 = pneg %p679_p13 }
  0x8d   : > { %p686_p2 = por %p685_p9, %p684_p5 }
  0x8e   : > { %471 = vmatpush3.msra.mxu0 %v236_v10 }
  0x8f   : > { %473 = vmatmul.mubr.msk.f32.vlgmr.msra.gmra.mrb[0].mxu0 %vm243_vm1, %v231_v11  ;;  %p687_p3 = pnand %p686_p2, %p680_p0 }
 0x105   : > { %v241_v12 = vpop.permute.xlu0 %240 }
 0x162   : > { %v313_v13 = vpop.f32.mrb[0].mxu0 }
 0x163   : > { %v314_v14 = vadd.f32 %v313_v13, %v241_v12  ;;  %v474_v15 = vpop.f32.mrb[1].mxu0 }
 0x165   : > { %v317_v16 = vmax.f32 %v314_v14, 0.0 }
 0x167   : > { %318 = vst [vmem:[%s230_s4] sm:$0xff] %v317_v16 }
 0x168   : > { %690 = shalt.err (!%p687_p3)
}
 0x169   : > { %s691_s22 = scalar_lea.hbm %s1027_s8, 128  ;;  %s695_s30 = scalar_lea.hbm %s1084_s3, 512 }
 0x16a   : > { %p692_p12 = scmp.ne.s32.totalorder %s1027_s8, %s691_s22  ;;  %p696_p8 = scmp.lt.u32.totalorder %s1027_s8, %s1084_s3 }
 0x16b   : > { %p697_p1 = scmp.lt.u32.totalorder %s695_s30, %s691_s22  ;;  %p699_p7 = scmp.lt.u32.totalorder %s691_s22, %s1027_s8 }
 0x16c   : > { %p693_p4 = pnand %p692_p12, %p1110_p11 }
 0x16d   : > { %p698_p10 = por %p697_p1, %p696_p8 }
 0x16e   : > { %p694_p6 = pneg %p693_p4 }
 0x16f   : > { %p700_p13 = por %p699_p7, %p698_p10 }
 0x171   : > { %p701_p0 = pnand %p700_p13, %p694_p6 }
 0x173   : > { %704 = shalt.err (!%p701_p0)
}
 0x174   : > { %494 = dma.vmem_to_hbm [thread:$0]  (%p1110_p11), %s1029_s9, 128, %s1027_s8, %s320_s15  }
 0x175 PF: > { %p516_p5 = scmp.ge.s32.totalorder %s779_s19, 2  ;;  %s347_s23 = sand.u32 1, %s751_s12  }
 0x176   : > { %p1111_p9 = scmp.ne.s32.totalorder %s1098_s27, 0  ;;  %s348_s25 = scalar_lea.sflag [#allocation4], %s347_s23 }
 0x178   : > { %p508_p2 = pnand %p516_p5, %p1111_p9 }
 0x17a   : > { %746 = dma.done.wait (!%p508_p2), %s348_s25, 128  }
 0x17b   : > { %748 = vsyncadd (!%p508_p2), %s348_s25, 4294967168  ;;  %s20_s19 = sadd.s32 1, %s779_s19   ;;  %s1112_s26 = sld [smem:[#allocation12_spill]] }
 0x17c   : > { %p17_p3 = scmp.ge.s32.totalorder %s20_s19, 6   ;;  %s1113_s12 = smov %s755_s13 }
 0x17d   : > { %s1114_s13 = smov %s759_s14  ;;  %s1115_s14 = smov %s976_s24 }
 0x17e   : > { %s1116_s15 = smov %s771_s17  ;;  %s1117_s16 = smov %s775_s18 }
 0x17f   : > { %s1119_s18 = smov %s1125_s10  ;;  %19 = sbr.rel (!%p17_p3) target bundleno = 11 (0xb), region = 85 }
 0x181   : > { %s1118_s17 = smov %s1112_s26 }
 0x186   :  { %353 = vsyncpa [#allocation3], 1 }
 0x187   :  { %355 = vsyncpa [#allocation3 + $0x1], 1 }
 0x188   :  { %356 = vsyncpa [#allocation6], 1 }
 0x189   :  { %357 = vsyncpa [#allocation4], 1 }
 0x18a   :  { %359 = vsyncpa [#allocation4 + $0x1], 1 }

</bundles_post_ra>
